<compile_context>
chip_gen: v7x
topology: tpu7x:2x2x1
jax: 0.10.0
libtpu: 0.0.40
codegen_flags: <defaults>
</compile_context>

<pallas_src>
import math

import jax
import jax.numpy as jnp
from jax.experimental import pallas as pl
from jax.experimental.pallas import tpu as pltpu

IN_FEATURES = 512  # fixed by the module definition
LANE = 128


def _linear_kernel(x_ref, w_ref, b_ref, o_ref):
    # x_ref: (tm, 512), w_ref: (512, tn), b_ref: (1, tn) f32, o_ref: (tm, tn)
    acc = jnp.dot(x_ref[...], w_ref[...], preferred_element_type=jnp.float32)
    o_ref[...] = (acc + b_ref[...]).astype(o_ref.dtype)


def language_embedder(languages, weight, bias, *, tm=512, tn=512, compute_dtype=None):
    """languages: [..., 512]; weight: [512, H]; bias: [H] -> [..., H].

    compute_dtype: optional (e.g. jnp.bfloat16) dtype for x/weight on the MXU;
    accumulation and the bias add stay in f32, output keeps the input dtype.
    """
    orig_shape = languages.shape
    H = weight.shape[1]
    x = languages.reshape(-1, IN_FEATURES)
    M = x.shape[0]

    # Lane-dense output: pad hidden dim (params only, one-time) to a multiple of 128.
    H_pad = -(-H // LANE) * LANE
    if H_pad != H:
        weight = jnp.pad(weight, ((0, 0), (0, H_pad - H)))
        bias = jnp.pad(bias, (0, H_pad - H))

    if compute_dtype is not None:
        x = x.astype(compute_dtype)
        weight = weight.astype(compute_dtype)

    bias2d = bias.astype(jnp.float32).reshape(1, H_pad)

    # Clamp tiles to the problem size; keep sublane/lane alignment.
    tm = min(tm, -(-M // 8) * 8)          # multiple of 8
    tn = min(tn, H_pad)                   # multiple of 128 (H_pad is)
    grid_m = pl.cdiv(M, tm)               # ragged last block handled by Pallas
    grid_n = pl.cdiv(H_pad, tn)

    out_dtype = languages.dtype
    bx = jnp.dtype(x.dtype).itemsize
    bw = jnp.dtype(weight.dtype).itemsize
    bo = jnp.dtype(out_dtype).itemsize

    # Double-buffered tile footprint -> explicit VMEM budget (portable to v7x's 64 MiB).
    tile_bytes = 2 * (
        tm * IN_FEATURES * bx      # x tile
        + IN_FEATURES * tn * bw    # weight tile
        + tn * 4                   # bias tile (f32)
        + tm * tn * bo             # output tile
    )
    vmem_limit = min(max(int(tile_bytes * 1.5) + (2 << 20), 8 << 20), 64 << 20)

    cost = pl.CostEstimate(
        flops=2 * M * IN_FEATURES * H_pad,
        transcendentals=0,
        bytes_accessed=M * IN_FEATURES * bx + IN_FEATURES * H_pad * bw + M * H_pad * bo,
    )

    out = pl.pallas_call(
        _linear_kernel,
        out_shape=jax.ShapeDtypeStruct((M, H_pad), out_dtype),
        grid_spec=pltpu.PrefetchScalarGridSpec(
            num_scalar_prefetch=0,
            # Rows innermost: the weight/bias blocks are constant over the inner
            # loop, so they are not re-fetched from HBM every step.
            grid=(grid_n, grid_m),
            in_specs=[
                pl.BlockSpec((tm, IN_FEATURES), lambda j, i: (i, 0)),
                pl.BlockSpec((IN_FEATURES, tn), lambda j, i: (0, j)),
                pl.BlockSpec((1, tn), lambda j, i: (0, j)),
            ],
            out_specs=pl.BlockSpec((tm, tn), lambda j, i: (i, j)),
        ),
        compiler_params=pltpu.CompilerParams(
            dimension_semantics=("parallel", "parallel"),
            vmem_limit_bytes=vmem_limit,
        ),
        cost_estimate=cost,
    )(x, weight, bias2d)

    if H_pad != H:
        out = out[:, :H]
    return out.reshape(*orig_shape[:-1], H)


def init_params(key, hidden_size, dtype=jnp.float32):
    # Deterministic init mirroring nn.Linear's default: U(-1/sqrt(fan_in), 1/sqrt(fan_in)).
    kw, kb = jax.random.split(key)
    bound = 1.0 / math.sqrt(IN_FEATURES)
    weight = jax.random.uniform(
        kw, (IN_FEATURES, hidden_size), dtype, minval=-bound, maxval=bound
    )
    bias = jax.random.uniform(
        kb, (hidden_size,), dtype, minval=-bound, maxval=bound
    )
    return weight, bias


if __name__ == "__main__":
    key = jax.random.PRNGKey(0)
    k_x, k_p = jax.random.split(key)

    batch, seq, hidden_size = 2, 8, 32
    languages = jax.random.normal(k_x, (batch, seq, IN_FEATURES), jnp.float32)
    weight, bias = init_params(k_p, hidden_size)

    # fp32 path (matches the torch module's numerics).
    out = language_embedder(languages, weight, bias)
    out = jax.block_until_ready(out)

    ref = languages @ weight + bias
    assert out.shape == (batch, seq, hidden_size), out.shape
    assert jnp.allclose(out, ref, atol=1e-5, rtol=1e-5), "fp32 mismatch vs reference"

    # bf16 compute path (f32 accumulation) — recommended for v6e/v7x throughput.
    out_bf16 = language_embedder(languages, weight, bias, compute_dtype=jnp.bfloat16)
    out_bf16 = jax.block_until_ready(out_bf16)
    assert out_bf16.shape == (batch, seq, hidden_size), out_bf16.shape
    assert jnp.allclose(out_bf16, ref, atol=5e-2, rtol=5e-2), "bf16 mismatch vs reference"

    print("KERNEL_OK")
</pallas_src>

<mosaic_0001>
module attributes {stable_mosaic.version = 11 : i64} {
  func.func @_linear_kernel(%arg0: i32, %arg1: i32, %arg2: memref<16x512xf32, #tpu.memory_space<vmem>>, %arg3: memref<512x128xf32, #tpu.memory_space<vmem>>, %arg4: memref<1x128xf32, #tpu.memory_space<vmem>>, %arg5: memref<16x128xf32, #tpu.memory_space<vmem>>) attributes {dimension_semantics = [#tpu.dimension_semantics<parallel>, #tpu.dimension_semantics<parallel>], iteration_bounds = array<i64: 1, 1>, scalar_prefetch = 0 : i64, scratch_operands = 0 : i64, tpu.core_type = #tpu.core_type<tc>, window_params = [{transform_indices = @transform_0, window_bounds = array<i64: 16, 512>}, {transform_indices = @transform_1, window_bounds = array<i64: 512, 128>}, {transform_indices = @transform_2, window_bounds = array<i64: 1, 128>}, {transform_indices = @transform_3, window_bounds = array<i64: 16, 128>}]} {
    %c0 = arith.constant 0 : index
    %c0_0 = arith.constant 0 : index
    %0 = vector.load %arg2[%c0, %c0_0] : memref<16x512xf32, #tpu.memory_space<vmem>>, vector<16x512xf32>
    %c0_1 = arith.constant 0 : index
    %c0_2 = arith.constant 0 : index
    %1 = vector.load %arg3[%c0_1, %c0_2] : memref<512x128xf32, #tpu.memory_space<vmem>>, vector<512x128xf32>
    %cst = arith.constant dense<0.000000e+00> : vector<16x128xf32>
    %2 = tpu.matmul %0, %1, %cst {dimension_numbers = #tpu.dot_dimension_numbers<[1], [0], [0], [1], [0, 0, 1, 1], [], []>} : vector<16x512xf32>, vector<512x128xf32>, vector<16x128xf32> -> vector<16x128xf32>
    %c0_3 = arith.constant 0 : index
    %c0_4 = arith.constant 0 : index
    %3 = vector.load %arg4[%c0_3, %c0_4] : memref<1x128xf32, #tpu.memory_space<vmem>>, vector<1x128xf32>
    %4 = vector.broadcast %3 : vector<1x128xf32> to vector<16x128xf32>
    %5 = arith.addf %2, %4 : vector<16x128xf32>
    %c0_5 = arith.constant 0 : index
    %c0_6 = arith.constant 0 : index
    %6 = vector.load %arg5[%c0_5, %c0_6] : memref<16x128xf32, #tpu.memory_space<vmem>>, vector<16x128xf32>
    tpu.vector_store %arg5[%c0_5, %c0_6], %5 {strides = array<i32>} : memref<16x128xf32, #tpu.memory_space<vmem>>, vector<16x128xf32>,
    return
  }
  func.func @transform_0(%arg0: i32, %arg1: i32) -> (i32, i32) {
    %c0_i32 = arith.constant 0 : i32
    %c0_i32_0 = arith.constant 0 : i32
    return %arg1, %c0_i32 : i32, i32
  }
  func.func @transform_1(%arg0: i32, %arg1: i32) -> (i32, i32) {
    %c0_i32 = arith.constant 0 : i32
    %c0_i32_0 = arith.constant 0 : i32
    return %c0_i32, %arg0 : i32, i32
  }
  func.func @transform_2(%arg0: i32, %arg1: i32) -> (i32, i32) {
    %c0_i32 = arith.constant 0 : i32
    %c0_i32_0 = arith.constant 0 : i32
    return %c0_i32, %arg0 : i32, i32
  }
  func.func @transform_3(%arg0: i32, %arg1: i32) -> (i32, i32) {
    %c0_i32 = arith.constant 0 : i32
    return %arg1, %arg0 : i32, i32
  }
}

</mosaic_0001>

<bundles_post_ra>
// kernel: tpu_custom_call.1
= control target key start
LH: loop header
LB: loop body
LE: loop exit
PB: predicated region body
PF: predicated region fallthrough
CT: control target
= control target key end

     0   :  { %8 = vsyncpa [#allocation3], 0  ;;  %s584_s0 = inlined_call_operand.hbm [shape: f32[16,512], index: 0, kind: input, shape index: {}]   ;;  %s585_s1 = inlined_call_operand.hbm [shape: f32[512,128], index: 1, kind: input, shape index: {}]   ;;  %s586_s2 = inlined_call_operand.vmem [shape: f32[1,128], index: 2, kind: input, shape index: {}]   ;;  %s587_s3 = inlined_call_operand.hbm [shape: f32[16,128], index: 3, kind: output, shape index: {}]  }
   0x1   :  { %9 = vsyncpa [#allocation6], 0 }
   0x2   :  { %10 = vsyncpa [#allocation4], 0  ;;  %s512_s12 = smov [#allocation2]   ;;  %s440_s16 = scalar_lea.hbm %s584_s0, 1024 }
   0x3   :  { %s16_s13 = sshll.u32 %s512_s12, 4  ;;  %p441_p0 = scmp.ne.s32.totalorder %s584_s0, %s440_s16  ;;  %s17_s13 = int_to_ptr.vmem [resolvable:$true] %s16_s13 }
   0x4   :  { %p444_p1 = scmp.lt.u32.totalorder %s440_s16, %s584_s0 }
   0x6   :  { %p446_p2 = pnand %p444_p1, %p441_p0 }
   0x8   :  { %449 = shalt.err (!%p446_p2)
}
   0x9   :  { %s450_s21 = scalar_lea.vmem %s17_s13, 1024  ;;  %p455_p4 = scmp.lt.s32.totalorder %s17_s13, %s17_s13 }
   0xa   :  { %p451_p3 = scmp.ne.s32.totalorder %s17_s13, %s450_s21  ;;  %p456_p5 = scmp.lt.s32.totalorder %s450_s21, %s450_s21 }
   0xc   :  { %p457_p6 = por %p456_p5, %p455_p4 }
   0xe   :  { %p458_p7 = pnand %p457_p6, %p451_p3 }
  0x10   :  { %461 = shalt.err (!%p458_p7)
}
  0x11   :  { %s513_s22 = smov 512   ;;  %s514_s23 = smov 32  }
  0x12   :  { %22 = dma.hbm_to_vmem [thread:$0]  %s584_s0, 1024, %s17_s13, [#allocation3], %s513_s22, %s513_s22, %s514_s23  }
  0x13   :  { %s515_s26 = smov [#allocation5]   ;;  %s462_s30 = scalar_lea.hbm %s585_s1, 8192 }
  0x14   :  { %s28_s27 = sshll.u32 %s515_s26, 4  ;;  %p463_p8 = scmp.ne.s32.totalorder %s585_s1, %s462_s30  ;;  %s29_s27 = int_to_ptr.vmem [resolvable:$true] %s28_s27 }
  0x15   :  { %p466_p9 = scmp.lt.u32.totalorder %s462_s30, %s585_s1 }
  0x17   :  { %p468_p10 = pnand %p466_p9, %p463_p8 }
  0x19   :  { %471 = shalt.err (!%p468_p10)
}
  0x1a   :  { %s472_s8 = scalar_lea.vmem %s29_s27, 8192  ;;  %p477_p12 = scmp.lt.s32.totalorder %s29_s27, %s29_s27 }
  0x1b   :  { %p473_p11 = scmp.ne.s32.totalorder %s29_s27, %s472_s8  ;;  %p478_p13 = scmp.lt.s32.totalorder %s472_s8, %s472_s8 }
  0x1d   :  { %p479_p0 = por %p478_p13, %p477_p12 }
  0x1f   :  { %p480_p1 = pnand %p479_p0, %p473_p11 }
  0x21   :  { %483 = shalt.err (!%p480_p1)
}
  0x22   :  { %s516_s0 = smov 128   ;;  %s517_s9 = smov 8  }
  0x23   :  { %34 = dma.hbm_to_vmem [thread:$0]  %s585_s1, 8192, %s29_s27, [#allocation6], %s516_s0, %s516_s0, %s517_s9  }
  0x24   :  { %506 = dma.done.wait [#allocation3], 1024  }
  0x25   :  { %507 = vsyncadd [#allocation3], 4294966272 }
  0x26   :  { %508 = dma.done.wait [#allocation6], 8192  }
  0x27   :  { %509 = vsyncadd [#allocation6], 4294959104  ;;  %v67_v0 = vld [vmem:[#allocation5 + $0x80] sm:$0xff]  ;;  %v68_v1 = vld [vmem:[#allocation5 + $0x88] sm:$0xff]  ;;  %s518_s13 = smov [#allocation7]  }
  0x28   :  { %v51_v2 = vld [vmem:[#allocation5] sm:$0xff]  ;;  %v369_v3 = vpack.c.bf16 %v68_v1, %v67_v0  ;;  %v52_v4 = vld [vmem:[#allocation5 + $0x8] sm:$0xff]  ;;  %v69_v11 = vld [vmem:[#allocation5 + $0x90] sm:$0xff]  ;;  %s279_s14 = sshll.u32 %s518_s13, 4  ;;  %s280_s14 = int_to_ptr.vmem [resolvable:$true] %s279_s14 }
  0x29   :  { %v99_v5 = vld [vmem:[#allocation5 + $0x180] sm:$0xff]  ;;  %v100_v6 = vld [vmem:[#allocation5 + $0x188] sm:$0xff]  ;;  %v371_v7 = vpack.c.bf16 %v52_v4, %v51_v2  ;;  %v70_v13 = vld [vmem:[#allocation5 + $0x98] sm:$0xff]  ;;  %p489_p3 = scmp.lt.s32.totalorder %s280_s14, %s280_s14 }
  0x2a   :  { %v401_v8 = vpack.c.bf16 %v100_v6, %v99_v5  ;;  %v83_v9 = vld [vmem:[#allocation5 + $0x100] sm:$0xff]  ;;  %v84_v10 = vld [vmem:[#allocation5 + $0x108] sm:$0xff]  ;;  %370 = vmatprep.subr.bf16.mxu0 %v369_v3  ;;  %v53_v14 = vld [vmem:[#allocation5 + $0x10] sm:$0xff]  ;;  %v373_v16 = vpack.c.bf16 %v70_v13, %v69_v11 }
  0x2b   :  { %v403_v12 = vpack.c.bf16 %v84_v10, %v83_v9  ;;  %v54_v15 = vld [vmem:[#allocation5 + $0x18] sm:$0xff]  ;;  %372 = vmatpush3.bf16.msra.mxu0 %v371_v7  ;;  %v101_v18 = vld [vmem:[#allocation5 + $0x190] sm:$0xff]  ;;  %v71_v23 = vld [vmem:[#allocation5 + $0xa0] sm:$0xff] }
  0x2c   :  { %402 = vmatprep.subr.bf16.mxu1 %v401_v8  ;;  %v375_v17 = vpack.c.bf16 %v54_v15, %v53_v14  ;;  %v102_v19 = vld [vmem:[#allocation5 + $0x198] sm:$0xff]  ;;  %v85_v20 = vld [vmem:[#allocation5 + $0x110] sm:$0xff]  ;;  %v72_v24 = vld [vmem:[#allocation5 + $0xa8] sm:$0xff]  ;;  %374 = vmatprep.subr.bf16.mxu0 %v373_v16 }
  0x2d   :  { %404 = vmatpush3.bf16.msra.mxu1 %v403_v12  ;;  %v405_v21 = vpack.c.bf16 %v102_v19, %v101_v18  ;;  %v86_v22 = vld [vmem:[#allocation5 + $0x118] sm:$0xff]  ;;  %v377_v26 = vpack.c.bf16 %v72_v24, %v71_v23  ;;  %v55_v27 = vld [vmem:[#allocation5 + $0x20] sm:$0xff]  ;;  %v56_v28 = vld [vmem:[#allocation5 + $0x28] sm:$0xff] }
  0x2e   :  { %v407_v25 = vpack.c.bf16 %v86_v22, %v85_v20  ;;  %v103_v29 = vld [vmem:[#allocation5 + $0x1a0] sm:$0xff]  ;;  %v104_v30 = vld [vmem:[#allocation5 + $0x1a8] sm:$0xff]  ;;  %v379_v33 = vpack.c.bf16 %v56_v28, %v55_v27  ;;  %v73_v35 = vld [vmem:[#allocation5 + $0xb0] sm:$0xff] }
  0x2f   :  { %406 = vmatprep.subr.bf16.mxu1 %v405_v21  ;;  %v87_v31 = vld [vmem:[#allocation5 + $0x120] sm:$0xff]  ;;  %v88_v32 = vld [vmem:[#allocation5 + $0x128] sm:$0xff]  ;;  %376 = vmatpush3.bf16.msra.mxu0 %v375_v17  ;;  %v409_v34 = vpack.c.bf16 %v104_v30, %v103_v29  ;;  %v74_v36 = vld [vmem:[#allocation5 + $0xb8] sm:$0xff] }
  0x30   :  { %v57_v37 = vld [vmem:[#allocation5 + $0x30] sm:$0xff]  ;;  %378 = vmatprep.subr.bf16.mxu0 %v377_v26  ;;  %v411_v38 = vpack.c.bf16 %v88_v32, %v87_v31  ;;  %v381_v39 = vpack.c.bf16 %v74_v36, %v73_v35  ;;  %v58_v40 = vld [vmem:[#allocation5 + $0x38] sm:$0xff]  ;;  %v75_v46 = vld [vmem:[#allocation5 + $0xc0] sm:$0xff] }
  0x31   :  { %408 = vmatpush3.bf16.msra.mxu1 %v407_v25  ;;  %v105_v41 = vld [vmem:[#allocation5 + $0x1b0] sm:$0xff]  ;;  %v106_v42 = vld [vmem:[#allocation5 + $0x1b8] sm:$0xff]  ;;  %v76_v47 = vld [vmem:[#allocation5 + $0xc8] sm:$0xff]  ;;  %v383_v48 = vpack.c.bf16 %v58_v40, %v57_v37 }
  0x32   :  { %410 = vmatprep.subr.bf16.mxu1 %v409_v34  ;;  %v413_v43 = vpack.c.bf16 %v106_v42, %v105_v41  ;;  %v89_v44 = vld [vmem:[#allocation5 + $0x130] sm:$0xff]  ;;  %v90_v45 = vld [vmem:[#allocation5 + $0x138] sm:$0xff]  ;;  %v107_v49 = vld [vmem:[#allocation5 + $0x1c0] sm:$0xff]  ;;  %v385_v52 = vpack.c.bf16 %v76_v47, %v75_v46 }
  0x33   :  { %380 = vmatpush3.bf16.msra.mxu0 %v379_v33  ;;  %v108_v50 = vld [vmem:[#allocation5 + $0x1c8] sm:$0xff]  ;;  %v415_v51 = vpack.c.bf16 %v90_v45, %v89_v44  ;;  %v59_v53 = vld [vmem:[#allocation5 + $0x40] sm:$0xff]  ;;  %v77_v58 = vld [vmem:[#allocation5 + $0xd0] sm:$0xff] }
  0x34   :  { %382 = vmatprep.subr.bf16.mxu0 %v381_v39  ;;  %v60_v54 = vld [vmem:[#allocation5 + $0x48] sm:$0xff]  ;;  %v91_v55 = vld [vmem:[#allocation5 + $0x140] sm:$0xff]  ;;  %v417_v56 = vpack.c.bf16 %v108_v50, %v107_v49  ;;  %v78_v59 = vld [vmem:[#allocation5 + $0xd8] sm:$0xff] }
  0x35   :  { %412 = vmatpush3.bf16.msra.mxu1 %v411_v38  ;;  %v92_v57 = vld [vmem:[#allocation5 + $0x148] sm:$0xff]  ;;  %v109_v60 = vld [vmem:[#allocation5 + $0x1d0] sm:$0xff]  ;;  %v110_v61 = vld [vmem:[#allocation5 + $0x1d8] sm:$0xff]  ;;  %v387_v62 = vpack.c.bf16 %v60_v54, %v59_v53  ;;  %v389_v0 = vpack.c.bf16 %v78_v59, %v77_v58 }
  0x36   :  { %414 = vmatprep.subr.bf16.mxu1 %v413_v43  ;;  %v419_v63 = vpack.c.bf16 %v92_v57, %v91_v55  ;;  %v61_v1 = vld [vmem:[#allocation5 + $0x50] sm:$0xff]  ;;  %v62_v2 = vld [vmem:[#allocation5 + $0x58] sm:$0xff]  ;;  %v421_v4 = vpack.c.bf16 %v110_v61, %v109_v60  ;;  %v79_v6 = vld [vmem:[#allocation5 + $0xe0] sm:$0xff] }
  0x37   :  { %384 = vmatpush3.bf16.msra.mxu0 %v383_v48  ;;  %v93_v3 = vld [vmem:[#allocation5 + $0x150] sm:$0xff]  ;;  %v94_v5 = vld [vmem:[#allocation5 + $0x158] sm:$0xff]  ;;  %v80_v7 = vld [vmem:[#allocation5 + $0xe8] sm:$0xff]  ;;  %v391_v10 = vpack.c.bf16 %v62_v2, %v61_v1 }
  0x38   :  { %386 = vmatprep.subr.bf16.mxu0 %v385_v52  ;;  %v111_v8 = vld [vmem:[#allocation5 + $0x1e0] sm:$0xff]  ;;  %v112_v9 = vld [vmem:[#allocation5 + $0x1e8] sm:$0xff]  ;;  %v423_v13 = vpack.c.bf16 %v94_v5, %v93_v3  ;;  %v393_v14 = vpack.c.bf16 %v80_v7, %v79_v6  ;;  %v81_v19 = vld [vmem:[#allocation5 + $0xf0] sm:$0xff] }
  0x39   :  { %416 = vmatpush3.bf16.msra.mxu1 %v415_v51  ;;  %v63_v11 = vld [vmem:[#allocation5 + $0x60] sm:$0xff]  ;;  %v64_v12 = vld [vmem:[#allocation5 + $0x68] sm:$0xff]  ;;  %v425_v18 = vpack.c.bf16 %v112_v9, %v111_v8  ;;  %v82_v20 = vld [vmem:[#allocation5 + $0xf8] sm:$0xff] }
  0x3a   :  { %418 = vmatprep.subr.bf16.mxu1 %v417_v56  ;;  %v95_v15 = vld [vmem:[#allocation5 + $0x160] sm:$0xff]  ;;  %v96_v16 = vld [vmem:[#allocation5 + $0x168] sm:$0xff]  ;;  %v46_v21 = vld [vmem:[#allocation2 + $0x18] sm:$0xff]  ;;  %v395_v24 = vpack.c.bf16 %v64_v12, %v63_v11  ;;  %v397_v26 = vpack.c.bf16 %v82_v20, %v81_v19 }
  0x3b   :  { %388 = vmatpush3.bf16.msra.mxu0 %v387_v62  ;;  %v44_v17 = vld [vmem:[#allocation2 + $0x8] sm:$0xff]  ;;  %v113_v22 = vld [vmem:[#allocation5 + $0x1f0] sm:$0xff]  ;;  %v114_v23 = vld [vmem:[#allocation5 + $0x1f8] sm:$0xff]  ;;  %261 = vmatprep.mubr.f32.mxu1 %v46_v21  ;;  %v427_v25 = vpack.c.bf16 %v96_v16, %v95_v15 }
  0x3c   :  { %390 = vmatprep.subr.bf16.mxu0 %v389_v0  ;;  %186 = vmatprep.mubr.f32.mxu0 %v44_v17  ;;  %v65_v27 = vld [vmem:[#allocation5 + $0x70] sm:$0xff]  ;;  %v66_v28 = vld [vmem:[#allocation5 + $0x78] sm:$0xff]  ;;  %v429_v29 = vpack.c.bf16 %v114_v23, %v113_v22  ;;  %v43_v34 = vld [vmem:[#allocation2] sm:$0xff] }
  0x3d   :  { %420 = vmatpush3.bf16.msra.mxu1 %v419_v63  ;;  %v97_v30 = vld [vmem:[#allocation5 + $0x170] sm:$0xff]  ;;  %v98_v31 = vld [vmem:[#allocation5 + $0x178] sm:$0xff]  ;;  %v399_v32 = vpack.c.bf16 %v66_v28, %v65_v27  ;;  %v48_v36 = vld [vmem:[#allocation2 + $0x28] sm:$0xff] }
  0x3e   :  { %422 = vmatprep.subr.bf16.mxu1 %v421_v4  ;;  %v431_v33 = vpack.c.bf16 %v98_v31, %v97_v30  ;;  %v45_v35 = vld [vmem:[#allocation2 + $0x10] sm:$0xff]  ;;  %v50_v37 = vld [vmem:[#allocation2 + $0x38] sm:$0xff]  ;;  %v47_v38 = vld [vmem:[#allocation2 + $0x20] sm:$0xff] }
  0x3f   :  { %392 = vmatpush3.bf16.msra.mxu0 %v391_v10  ;;  %v49_v39 = vld [vmem:[#allocation2 + $0x30] sm:$0xff]  ;;  %v292_v41 = vld [vmem:[%s586_s2] ss:$0 sm:$0xff]  ;;  %s484_s2 = scalar_lea.vmem %s280_s14, 256 }
  0x40   :  { %394 = vmatprep.subr.bf16.mxu0 %v393_v14  ;;  %p485_p2 = scmp.ne.s32.totalorder %s280_s14, %s484_s2  ;;  %p490_p4 = scmp.lt.s32.totalorder %s484_s2, %s484_s2 }
  0x41   :  { %424 = vmatpush3.bf16.msra.mxu1 %v423_v13 }
  0x42   :  { %426 = vmatprep.subr.bf16.mxu1 %v425_v18  ;;  %p491_p5 = por %p490_p4, %p489_p3 }
  0x43   :  { %396 = vmatpush3.bf16.msra.mxu0 %v395_v24 }
  0x44   :  { %398 = vmatprep.subr.bf16.mxu0 %v397_v26  ;;  %p492_p6 = pnand %p491_p5, %p485_p2 }
  0x45   :  { %428 = vmatpush3.bf16.msra.mxu1 %v427_v25 }
  0x46   :  { %430 = vmatprep.subr.bf16.mxu1 %v429_v29 }
  0x47   :  { %400 = vmatpush3.bf16.msra.mxu0 %v399_v32 }
  0x49   :  { %432 = vmatpush3.bf16.msra.mxu1 %v431_v33 }
  0x4a   :  { %187 = vmatmul.mubr.f32.vlgmr.msra.gmra.mrb[0].mxu0 %v43_v34 }
  0x4b   :  { %191 = vmatprep.mubr.f32.mxu0 %v48_v36 }
  0x4c   :  { %262 = vmatmul.mubr.f32.vlgmr.msra.gmra.mrb[0].mxu1 %v45_v35 }
  0x4d   :  { %266 = vmatprep.mubr.f32.mxu1 %v50_v37 }
  0x4e   :  { %192 = vmatmul.mubr.f32.gmra.mrb[2].mxu0 %v47_v38 }
  0x50   :  { %267 = vmatmul.mubr.f32.gmra.mrb[2].mxu1 %v49_v39 }
 0x11d   :  { %v325_v40 = vpop.f32.mrb[0].mxu0 }
 0x11e   :  { %v326_v42 = vpop.f32.mrb[1].mxu0 }
 0x11f   :  { %v363_v43 = vpop.f32.mrb[0].mxu1  ;;  %v327_v44 = vadd.f32 %v326_v42, %v325_v40 }
 0x120   :  { %v364_v45 = vpop.f32.mrb[1].mxu1 }
 0x121   :  { %v365_v46 = vadd.f32 %v364_v45, %v363_v43  ;;  %v189_v47 = vadd.f32 %v327_v44, %v292_v41  ;;  %v328_v48 = vpop.f32.mrb[2].mxu0 }
 0x122   :  { %v329_v49 = vpop.f32.mrb[3].mxu0 }
 0x123   :  { %v366_v50 = vpop.f32.mrb[2].mxu1  ;;  %v264_v51 = vadd.f32 %v365_v46, %v189_v47  ;;  %v330_v52 = vadd.f32 %v329_v49, %v328_v48 }
 0x124   :  { %v367_v53 = vpop.f32.mrb[3].mxu1 }
 0x125   :  { %v368_v54 = vadd.f32 %v367_v53, %v366_v50  ;;  %272 = vst [vmem:[#allocation7] sm:$0xff] %v264_v51  ;;  %v194_v55 = vadd.f32 %v330_v52, %v292_v41 }
 0x127   :  { %v269_v56 = vadd.f32 %v368_v54, %v194_v55 }
 0x129   :  { %273 = vst [vmem:[#allocation7 + $0x8] sm:$0xff] %v269_v56 }
 0x12a   :  { %495 = shalt.err (!%p492_p6)
}
 0x12b   :  { %s496_s17 = scalar_lea.hbm %s587_s3, 256 }
 0x12c   :  { %p497_p7 = scmp.ne.s32.totalorder %s587_s3, %s496_s17  ;;  %p500_p8 = scmp.lt.u32.totalorder %s496_s17, %s587_s3 }
 0x12e   :  { %p502_p9 = pnand %p500_p8, %p497_p7 }
 0x130   :  { %505 = shalt.err (!%p502_p9)
}
 0x131   :  { %285 = dma.vmem_to_hbm [thread:$0]  %s280_s14, 256, %s587_s3, [#allocation4], %s516_s0, %s516_s0, %s517_s9  }
 0x132   :  { %510 = dma.done.wait [#allocation4], 256  }
 0x133   :  { %511 = vsyncadd [#allocation4], 4294967040 }
 0x134   :  { %289 = vsyncpa [#allocation3], 1 }
 0x135   :  { %290 = vsyncpa [#allocation6], 1 }
 0x136   :  { %291 = vsyncpa [#allocation4], 1 }

</bundles_post_ra>
